<compile_context>
chip_gen: v7x
topology: tpu7x:2x2x1
jax: 0.10.0
libtpu: 0.0.40
codegen_flags: <defaults>
</compile_context>

<pallas_src>
import jax
import jax.numpy as jnp
from jax.experimental import pallas as pl
from jax.experimental.pallas import tpu as pltpu


def _round_up(x, m):
    return (x + m - 1) // m * m


def make_textcnn_kernel(Sp):
    """Sp: padded (multiple-of-8) per-sentence time extent inside the slab."""

    def kernel(xw_ref, wconv_ref, bconv_ref, wfc_ref, bfc_ref, mask_ref, out_ref):
        rows = xw_ref.shape[0]            # Bt * Sp
        Bt = rows // Sp
        Fp = wconv_ref.shape[1]

        # All three conv branches in ONE K=4E MXU matmul: the input rows are
        # pre-windowed as [x[t], x[t+1], x[t+2], x[t+3]] along the lane axis
        # and wconv is the matching (4E, Fp) tap stack (taps >= f are zero for
        # branch f).  f32 accumulation on the MXU.
        acc = jnp.dot(xw_ref[...], wconv_ref[...],
                      preferred_element_type=jnp.float32)          # (rows, Fp)
        acc = jnp.maximum(acc + bconv_ref[...], 0.0)               # bias + ReLU

        # Max over time per sentence.  The precomputed (Sp, Fp) validity mask
        # zeroes invalid time positions POST-ReLU, which is exact because
        # every valid max candidate is >= 0.
        feat = jnp.max(acc.reshape(Bt, Sp, Fp) * mask_ref[...], axis=1)  # (Bt, Fp)

        # Fused FC + sigmoid, lane-dense (Bt, Cp) store.
        logits = jnp.dot(feat.astype(wfc_ref.dtype), wfc_ref[...],
                         preferred_element_type=jnp.float32) + bfc_ref[...]
        out_ref[...] = jax.nn.sigmoid(logits)

    return kernel


def textcnn_forward(x_tokens, emb_table, conv_ws, conv_bs, wfc, bfc,
                    *, batch_tile=128, compute_dtype=jnp.bfloat16,
                    vmem_limit_bytes=32 * 1024 * 1024):
    """x_tokens: (B, S, L) int32 -> (B, n_class) float32 probabilities."""
    B, S, L = x_tokens.shape
    E = emb_table.shape[1]
    F = conv_ws[0].shape[0]
    C = wfc.shape[0]
    assert S >= 4, "TextCNN needs S >= 4 (largest conv filter height)"
    assert batch_tile % 8 == 0

    Sp = _round_up(S, 8)               # per-sentence time extent (sublane tile)
    Fp = _round_up(3 * F, 128)         # lane-dense fused filter dim
    Cp = _round_up(C, 128)             # lane-dense FC output dim

    # Batch tile: big enough to amortize per-grid-step overhead (>=1024 LHS
    # rows at Bt=128, Sp>=8), but capped so the "parallel" grid axis keeps
    # >= 2 steps when the batch allows it (v7x: 2 TensorCores per chip).
    Bt = min(batch_tile, max(8, _round_up((B + 1) // 2, 8)))
    assert Bt % 8 == 0
    Bp = _round_up(B, Bt)

    # ---- glue in plain JAX: embedding gather fused with the word-axis max ----
    # TODO(synk): the data-dependent embedding gather stays in JAX; at
    # production vocab/B/L it is the dominant HBM consumer and could move
    # in-kernel via scalar-prefetched token ids + per-row DMA.
    emb = jnp.take(emb_table, x_tokens, axis=0)                   # (B, S, L, E)
    pooled = jnp.max(emb.astype(compute_dtype), axis=2)           # (B, S, E)

    # Windowed (taps packed along the contraction dim) input:
    #   win[b, t] = [pooled[b,t], pooled[b,t+1], pooled[b,t+2], pooled[b,t+3]]
    # with zero padding past S, flattened to a lane-dense (Bp*Sp, 4E) slab.
    p = (jnp.zeros((Bp, Sp + 3, E), compute_dtype)
         .at[:B, :S, :].set(pooled))
    win = jnp.concatenate([p[:, j:j + Sp, :] for j in range(4)], axis=-1)
    win_flat = win.reshape(Bp * Sp, 4 * E)

    # ---- fuse the 3 conv branches into one zero-padded (4E, Fp) tap stack ----
    wconv = jnp.zeros((4, E, Fp), jnp.float32)
    bconv = jnp.zeros((1, Fp), jnp.float32)
    for i, f in enumerate((2, 3, 4)):
        w = jnp.transpose(conv_ws[i][:, 0], (1, 2, 0))            # (f, E, F)
        wconv = wconv.at[:f, :, i * F:(i + 1) * F].set(w)
        bconv = bconv.at[0, i * F:(i + 1) * F].set(conv_bs[i])
    wconv = wconv.reshape(4 * E, Fp)

    wfc_m = jnp.zeros((Fp, Cp), jnp.float32).at[:3 * F, :C].set(wfc.T)
    bfc_m = jnp.zeros((1, Cp), jnp.float32).at[0, :C].set(bfc)

    # Grid-invariant time-validity mask (depends only on static S, F, Sp, Fp):
    # valid conv outputs for filter height f live at t in [0, S - f].
    col = jnp.arange(Fp)
    thr = jnp.where(col < F, S - 2,
          jnp.where(col < 2 * F, S - 3,
          jnp.where(col < 3 * F, S - 4, -1)))
    mask = (jnp.arange(Sp)[:, None] <= thr[None, :]).astype(jnp.float32)

    out = pl.pallas_call(
        make_textcnn_kernel(Sp),
        out_shape=jax.ShapeDtypeStruct((Bp, Cp), jnp.float32),
        grid=(Bp // Bt,),
        in_specs=[
            pl.BlockSpec((Bt * Sp, 4 * E), lambda b: (b, 0)),
            # grid-invariant weights / biases / mask (tiny; would be
            # single-buffered or scratch-hoisted at production sizes)
            pl.BlockSpec((4 * E, Fp), lambda b: (0, 0)),
            pl.BlockSpec((1, Fp), lambda b: (0, 0)),
            pl.BlockSpec((Fp, Cp), lambda b: (0, 0)),
            pl.BlockSpec((1, Cp), lambda b: (0, 0)),
            pl.BlockSpec((Sp, Fp), lambda b: (0, 0)),
        ],
        out_specs=pl.BlockSpec((Bt, Cp), lambda b: (b, 0)),
        compiler_params=pltpu.CompilerParams(
            dimension_semantics=("parallel",),
            vmem_limit_bytes=vmem_limit_bytes),
    )(win_flat,
      wconv.astype(compute_dtype), bconv,
      wfc_m.astype(compute_dtype), bfc_m, mask)

    return out[:B, :C]


def textcnn_ref(x_tokens, emb_table, conv_ws, conv_bs, wfc, bfc):
    """Pure-JAX f32 reference with torch-layout weights."""
    emb = jnp.take(emb_table, x_tokens, axis=0).astype(jnp.float32)   # (B,S,L,E)
    pooled = jnp.max(emb, axis=2)                                     # (B,S,E)
    feats = []
    for w, b, f in zip(conv_ws, conv_bs, (2, 3, 4)):
        T = pooled.shape[1] - f + 1
        windows = jnp.stack([pooled[:, i:i + T, :] for i in range(f)], axis=2)  # (B,T,f,E)
        out = jnp.einsum('btie,cie->btc', windows, w[:, 0]) + b
        out = jnp.maximum(out, 0.0)
        feats.append(jnp.max(out, axis=1))
    feat = jnp.concatenate(feats, axis=-1)                            # (B, 3F)
    logits = feat @ wfc.T + bfc
    return jax.nn.sigmoid(logits)


if __name__ == "__main__":
    vocab_size, n_class = 50, 4
    embed_dim, num_filters = 32, 16
    B, S, L = 2, 8, 6

    key = jax.random.PRNGKey(0)
    keys = jax.random.split(key, 10)

    emb_table = 0.1 * jax.random.normal(keys[0], (vocab_size, embed_dim), jnp.float32)
    conv_ws = [0.1 * jax.random.normal(keys[1 + i], (num_filters, 1, f, embed_dim), jnp.float32)
               for i, f in enumerate((2, 3, 4))]
    conv_bs = [0.1 * jax.random.normal(keys[4 + i], (num_filters,), jnp.float32) for i in range(3)]
    wfc = 0.1 * jax.random.normal(keys[7], (n_class, 3 * num_filters), jnp.float32)
    bfc = 0.1 * jax.random.normal(keys[8], (n_class,), jnp.float32)

    x = jax.random.randint(keys[9], (B, S, L), 0, vocab_size, dtype=jnp.int32)

    ref = textcnn_ref(x, emb_table, conv_ws, conv_bs, wfc, bfc)

    # f32 run: exactness check against the pure-JAX reference.
    out_f32 = textcnn_forward(x, emb_table, conv_ws, conv_bs, wfc, bfc,
                              compute_dtype=jnp.float32)
    out_f32 = jax.block_until_ready(out_f32)
    assert out_f32.shape == (B, n_class)
    assert jnp.allclose(out_f32, ref, atol=1e-4, rtol=1e-4), (out_f32, ref)

    # Production default: bf16 operands, f32 accumulation (v6e/v7x native rate).
    out_bf16 = textcnn_forward(x, emb_table, conv_ws, conv_bs, wfc, bfc)
    out_bf16 = jax.block_until_ready(out_bf16)
    assert out_bf16.shape == (B, n_class)
    assert jnp.allclose(out_bf16, ref, atol=2e-2, rtol=0.0), (out_bf16, ref)

    print("KERNEL_OK")
</pallas_src>

<mosaic_0001>
module attributes {stable_mosaic.version = 11 : i64} {
  func.func @kernel(%arg0: i32, %arg1: memref<64x128xf32, #tpu.memory_space<vmem>>, %arg2: memref<128x128xf32, #tpu.memory_space<vmem>>, %arg3: memref<1x128xf32, #tpu.memory_space<vmem>>, %arg4: memref<128x128xf32, #tpu.memory_space<vmem>>, %arg5: memref<1x128xf32, #tpu.memory_space<vmem>>, %arg6: memref<8x128xf32, #tpu.memory_space<vmem>>, %arg7: memref<8x128xf32, #tpu.memory_space<vmem>>) attributes {dimension_semantics = [#tpu.dimension_semantics<parallel>], iteration_bounds = array<i64: 1>, scalar_prefetch = 0 : i64, scratch_operands = 0 : i64, tpu.core_type = #tpu.core_type<tc>, window_params = [{transform_indices = @transform_0, window_bounds = array<i64: 64, 128>}, {pipeline_mode = #tpu.pipeline_mode<synchronous>, transform_indices = @transform_1, window_bounds = array<i64: 128, 128>}, {pipeline_mode = #tpu.pipeline_mode<synchronous>, transform_indices = @transform_2, window_bounds = array<i64: 1, 128>}, {pipeline_mode = #tpu.pipeline_mode<synchronous>, transform_indices = @transform_3, window_bounds = array<i64: 128, 128>}, {pipeline_mode = #tpu.pipeline_mode<synchronous>, transform_indices = @transform_4, window_bounds = array<i64: 1, 128>}, {pipeline_mode = #tpu.pipeline_mode<synchronous>, transform_indices = @transform_5, window_bounds = array<i64: 8, 128>}, {transform_indices = @transform_6, window_bounds = array<i64: 8, 128>}]} {
    %c0 = arith.constant 0 : index
    %c0_0 = arith.constant 0 : index
    %0 = vector.load %arg1[%c0, %c0_0] : memref<64x128xf32, #tpu.memory_space<vmem>>, vector<64x128xf32>
    %c0_1 = arith.constant 0 : index
    %c0_2 = arith.constant 0 : index
    %1 = vector.load %arg2[%c0_1, %c0_2] : memref<128x128xf32, #tpu.memory_space<vmem>>, vector<128x128xf32>
    %cst = arith.constant dense<0.000000e+00> : vector<64x128xf32>
    %2 = tpu.matmul %0, %1, %cst {dimension_numbers = #tpu.dot_dimension_numbers<[1], [0], [0], [1], [0, 0, 1, 1], [], []>} : vector<64x128xf32>, vector<128x128xf32>, vector<64x128xf32> -> vector<64x128xf32>
    %c0_3 = arith.constant 0 : index
    %c0_4 = arith.constant 0 : index
    %3 = vector.load %arg3[%c0_3, %c0_4] : memref<1x128xf32, #tpu.memory_space<vmem>>, vector<1x128xf32>
    %4 = vector.broadcast %3 : vector<1x128xf32> to vector<64x128xf32>
    %5 = arith.addf %2, %4 : vector<64x128xf32>
    %cst_5 = arith.constant 0.000000e+00 : f32
    %6 = vector.broadcast %cst_5 : f32 to vector<64x128xf32>
    %7 = arith.maximumf %5, %6 : vector<64x128xf32>
    %8 = vector.shape_cast %7 : vector<64x128xf32> to vector<8x8x128xf32>
    %c0_6 = arith.constant 0 : index
    %c0_7 = arith.constant 0 : index
    %9 = vector.load %arg6[%c0_6, %c0_7] : memref<8x128xf32, #tpu.memory_space<vmem>>, vector<8x128xf32>
    %10 = vector.shape_cast %9 : vector<8x128xf32> to vector<1x8x128xf32>
    %11 = vector.broadcast %10 : vector<1x8x128xf32> to vector<8x8x128xf32>
    %12 = arith.mulf %8, %11 : vector<8x8x128xf32>
    %cst_8 = arith.constant dense<0xFF800000> : vector<8x128xf32>
    %13 = vector.multi_reduction <maximumf>, %12, %cst_8 [1] : vector<8x8x128xf32> to vector<8x128xf32>
    %c0_9 = arith.constant 0 : index
    %c0_10 = arith.constant 0 : index
    %14 = vector.load %arg4[%c0_9, %c0_10] : memref<128x128xf32, #tpu.memory_space<vmem>>, vector<128x128xf32>
    %cst_11 = arith.constant dense<0.000000e+00> : vector<8x128xf32>
    %15 = tpu.matmul %13, %14, %cst_11 {dimension_numbers = #tpu.dot_dimension_numbers<[1], [0], [0], [1], [0, 0, 1, 1], [], []>} : vector<8x128xf32>, vector<128x128xf32>, vector<8x128xf32> -> vector<8x128xf32>
    %c0_12 = arith.constant 0 : index
    %c0_13 = arith.constant 0 : index
    %16 = vector.load %arg5[%c0_12, %c0_13] : memref<1x128xf32, #tpu.memory_space<vmem>>, vector<1x128xf32>
    %17 = vector.broadcast %16 : vector<1x128xf32> to vector<8x128xf32>
    %18 = arith.addf %15, %17 : vector<8x128xf32>
    %19 = arith.negf %18 : vector<8x128xf32>
    %20 = math.exp %19 : vector<8x128xf32>
    %cst_14 = arith.constant 1.000000e+00 : f32
    %21 = vector.broadcast %cst_14 : f32 to vector<8x128xf32>
    %22 = arith.addf %21, %20 : vector<8x128xf32>
    %23 = arith.divf %21, %22 : vector<8x128xf32>
    %c0_15 = arith.constant 0 : index
    %c0_16 = arith.constant 0 : index
    %24 = vector.load %arg7[%c0_15, %c0_16] : memref<8x128xf32, #tpu.memory_space<vmem>>, vector<8x128xf32>
    tpu.vector_store %arg7[%c0_15, %c0_16], %23 {strides = array<i32>} : memref<8x128xf32, #tpu.memory_space<vmem>>, vector<8x128xf32>,
    return
  }
  func.func @transform_0(%arg0: i32) -> (i32, i32) {
    %c0_i32 = arith.constant 0 : i32
    %c0_i32_0 = arith.constant 0 : i32
    return %arg0, %c0_i32 : i32, i32
  }
  func.func @transform_1(%arg0: i32) -> (i32, i32) {
    %c0_i32 = arith.constant 0 : i32
    %c0_i32_0 = arith.constant 0 : i32
    %c0_i32_1 = arith.constant 0 : i32
    return %c0_i32, %c0_i32_0 : i32, i32
  }
  func.func @transform_2(%arg0: i32) -> (i32, i32) {
    %c0_i32 = arith.constant 0 : i32
    %c0_i32_0 = arith.constant 0 : i32
    %c0_i32_1 = arith.constant 0 : i32
    return %c0_i32, %c0_i32_0 : i32, i32
  }
  func.func @transform_3(%arg0: i32) -> (i32, i32) {
    %c0_i32 = arith.constant 0 : i32
    %c0_i32_0 = arith.constant 0 : i32
    %c0_i32_1 = arith.constant 0 : i32
    return %c0_i32, %c0_i32_0 : i32, i32
  }
  func.func @transform_4(%arg0: i32) -> (i32, i32) {
    %c0_i32 = arith.constant 0 : i32
    %c0_i32_0 = arith.constant 0 : i32
    %c0_i32_1 = arith.constant 0 : i32
    return %c0_i32, %c0_i32_0 : i32, i32
  }
  func.func @transform_5(%arg0: i32) -> (i32, i32) {
    %c0_i32 = arith.constant 0 : i32
    %c0_i32_0 = arith.constant 0 : i32
    %c0_i32_1 = arith.constant 0 : i32
    return %c0_i32, %c0_i32_0 : i32, i32
  }
  func.func @transform_6(%arg0: i32) -> (i32, i32) {
    %c0_i32 = arith.constant 0 : i32
    %c0_i32_0 = arith.constant 0 : i32
    return %arg0, %c0_i32 : i32, i32
  }
}

</mosaic_0001>

<bundles_post_ra>
// kernel: tpu_custom_call.1
= control target key start
LH: loop header
LB: loop body
LE: loop exit
PB: predicated region body
PF: predicated region fallthrough
CT: control target
= control target key end

     0   :  { %11 = vsyncpa [#allocation3], 0  ;;  %s809_s0 = inlined_call_operand.hbm [shape: f32[64,128], index: 0, kind: input, shape index: {}]   ;;  %s810_s1 = inlined_call_operand.hbm [shape: f32[128,128], index: 1, kind: input, shape index: {}]   ;;  %s811_s2 = inlined_call_operand.vmem [shape: f32[1,128], index: 2, kind: input, shape index: {}]   ;;  %s812_s3 = inlined_call_operand.hbm [shape: f32[128,128], index: 3, kind: input, shape index: {}]   ;;  %s813_s4 = inlined_call_operand.vmem [shape: f32[1,128], index: 4, kind: input, shape index: {}]   ;;  %s814_s5 = inlined_call_operand.vmem [shape: f32[8,128], index: 5, kind: input, shape index: {}]   ;;  %s815_s6 = inlined_call_operand.hbm [shape: f32[8,128], index: 6, kind: output, shape index: {}]  }
   0x1   :  { %12 = vsyncpa [#allocation6], 0 }
   0x2   :  { %13 = vsyncpa [#allocation4], 0  ;;  %s691_s21 = smov [#allocation5]   ;;  %s692_s23 = smov [#allocation2]  }
   0x3   :  { %s31_s22 = sshll.u32 %s691_s21, 4  ;;  %s19_s24 = sshll.u32 %s692_s23, 4  ;;  %s32_s22 = int_to_ptr.vmem [resolvable:$true] %s31_s22  ;;  %s735_s24 = int_to_ptr.vmem [resolvable:$true] %s19_s24 }
   0x4   :  { %s597_s27 = scalar_lea.hbm %s810_s1, 2048 }
   0x5   :  { %p598_p0 = scmp.ne.s32.totalorder %s810_s1, %s597_s27  ;;  %p601_p1 = scmp.lt.u32.totalorder %s597_s27, %s810_s1 }
   0x7   :  { %p603_p2 = pnand %p601_p1, %p598_p0 }
   0x9   :  { %606 = shalt.err (!%p603_p2)
}
   0xa   :  { %s607_s8 = scalar_lea.vmem %s32_s22, 2048  ;;  %p612_p4 = scmp.lt.s32.totalorder %s32_s22, %s32_s22 }
   0xb   :  { %p608_p3 = scmp.ne.s32.totalorder %s32_s22, %s607_s8  ;;  %p613_p5 = scmp.lt.s32.totalorder %s607_s8, %s607_s8 }
   0xd   :  { %p614_p6 = por %p613_p5, %p612_p4 }
   0xf   :  { %p615_p7 = pnand %p614_p6, %p608_p3 }
  0x11   :  { %618 = shalt.err (!%p615_p7)
}
  0x12   :  { %s693_s9 = smov 128   ;;  %s694_s10 = smov 8  }
  0x13   :  { %37 = dma.hbm_to_vmem [thread:$0]  %s810_s1, 2048, %s32_s22, [#allocation6], %s693_s9, %s693_s9, %s694_s10  }
  0x14   :  { %s619_s15 = scalar_lea.hbm %s809_s0, 1024 }
  0x15   :  { %p620_p8 = scmp.ne.s32.totalorder %s809_s0, %s619_s15  ;;  %p623_p9 = scmp.lt.u32.totalorder %s619_s15, %s809_s0 }
  0x17   :  { %p625_p10 = pnand %p623_p9, %p620_p8 }
  0x19   :  { %628 = shalt.err (!%p625_p10)
}
  0x1a   :  { %s629_s20 = scalar_lea.vmem %s735_s24, 1024  ;;  %p634_p12 = scmp.lt.s32.totalorder %s735_s24, %s735_s24 }
  0x1b   :  { %p630_p11 = scmp.ne.s32.totalorder %s735_s24, %s629_s20  ;;  %p635_p13 = scmp.lt.s32.totalorder %s629_s20, %s629_s20 }
  0x1d   :  { %p636_p0 = por %p635_p13, %p634_p12 }
  0x1f   :  { %p637_p1 = pnand %p636_p0, %p630_p11 }
  0x21   :  { %640 = shalt.err (!%p637_p1)
}
  0x22   :  { %25 = dma.hbm_to_vmem [thread:$0]  %s809_s0, 1024, %s735_s24, [#allocation3], %s693_s9, %s693_s9, %s694_s10  }
  0x23   :  { %s695_s22 = smov [#allocation7]   ;;  %s641_s27 = scalar_lea.hbm %s812_s3, 2048 }
  0x24   :  { %s45_s23 = sshll.u32 %s695_s22, 4  ;;  %p642_p2 = scmp.ne.s32.totalorder %s812_s3, %s641_s27  ;;  %s46_s23 = int_to_ptr.vmem [resolvable:$true] %s45_s23 }
  0x25   :  { %p645_p3 = scmp.lt.u32.totalorder %s641_s27, %s812_s3 }
  0x27   :  { %p647_p4 = pnand %p645_p3, %p642_p2 }
  0x29   :  { %650 = shalt.err (!%p647_p4)
}
  0x2a   :  { %s651_s8 = scalar_lea.vmem %s46_s23, 2048  ;;  %p656_p6 = scmp.lt.s32.totalorder %s46_s23, %s46_s23 }
  0x2b   :  { %p652_p5 = scmp.ne.s32.totalorder %s46_s23, %s651_s8  ;;  %p657_p7 = scmp.lt.s32.totalorder %s651_s8, %s651_s8 }
  0x2d   :  { %p658_p8 = por %p657_p7, %p656_p6 }
  0x2f   :  { %p659_p9 = pnand %p658_p8, %p652_p5 }
  0x31   :  { %662 = shalt.err (!%p659_p9)
}
  0x32   :  { %51 = dma.hbm_to_vmem [thread:$0]  %s812_s3, 2048, %s46_s23, [#allocation6], %s693_s9, %s693_s9, %s694_s10  }
  0x33   :  { %685 = dma.done.wait [#allocation3], 1024  }
  0x34   :  { %686 = vsyncadd [#allocation3], 4294966272 }
  0x35   :  { %687 = dma.done.wait [#allocation6], 4096  }
  0x36   :  { %688 = vsyncadd [#allocation6], 4294963200  ;;  %v73_v0 = vld [vmem:[#allocation5] sm:$0xff]  ;;  %v74_v1 = vld [vmem:[#allocation5 + $0x8] sm:$0xff]  ;;  %v696_v35 = vmov 0.0|0.0   ;;  %vm697_vm0 = vmmov 0  }
  0x37   :  { %v75_v2 = vld [vmem:[#allocation5 + $0x10] sm:$0xff]  ;;  %v528_v3 = vpack.c.bf16 %v74_v1, %v73_v0  ;;  %v76_v4 = vld [vmem:[#allocation5 + $0x18] sm:$0xff]  ;;  %v77_v6 = vld [vmem:[#allocation5 + $0x20] sm:$0xff]  ;;  %560 = vmatprep.subr.bf16.mxu1 %v696_v35  ;;  %v698_v57 = vmov 0.0   ;;  %vm297_vm1 = vcmask 1041409   ;;  %vm299_vm2 = vcmask 1042434  }
  0x38   :  { %v532_v5 = vpack.c.bf16 %v76_v4, %v75_v2  ;;  %v78_v7 = vld [vmem:[#allocation5 + $0x28] sm:$0xff]  ;;  %v65_v9 = vld [vmem:[#allocation2] sm:$0xff]  ;;  %v79_v10 = vld [vmem:[#allocation5 + $0x30] sm:$0xff]  ;;  %525 = vmatprep.mubr.msk.f32.mxu1 %vm697_vm0, %v698_v57  ;;  %vm301_vm3 = vcmask 1043459   ;;  %vm303_vm4 = vcmask 1044484   ;;  %vm305_vm5 = vcmask 1045509  }
  0x39   :  { %529 = vmatprep.subr.bf16.mxu0 %v528_v3  ;;  %v536_v8 = vpack.c.bf16 %v78_v7, %v77_v6  ;;  %v80_v11 = vld [vmem:[#allocation5 + $0x38] sm:$0xff]  ;;  %481 = vmatprep.mubr.f32.mxu0 %v65_v9  ;;  %v81_v13 = vld [vmem:[#allocation5 + $0x40] sm:$0xff]  ;;  %v82_v14 = vld [vmem:[#allocation5 + $0x48] sm:$0xff]  ;;  %vm307_vm6 = vcmask 1046534   ;;  %vm309_vm7 = vcmask 1047559   ;;  %s699_s12 = smov [#allocation8]  }
  0x3a   :  { %531 = vmatpush3.bf16.msra.mxu0 %v528_v3  ;;  %v540_v12 = vpack.c.bf16 %v80_v11, %v79_v10  ;;  %v544_v15 = vpack.c.bf16 %v82_v14, %v81_v13  ;;  %v83_v16 = vld [vmem:[#allocation5 + $0x50] sm:$0xff]  ;;  %v84_v17 = vld [vmem:[#allocation5 + $0x58] sm:$0xff]  ;;  %v85_v19 = vld [vmem:[#allocation5 + $0x60] sm:$0xff]  ;;  %s395_s13 = sshll.u32 %s699_s12, 4  ;;  %s396_s13 = int_to_ptr.vmem [resolvable:$true] %s395_s13 }
  0x3b   :  { %533 = vmatprep.subr.bf16.mxu0 %v532_v5  ;;  %v548_v18 = vpack.c.bf16 %v84_v17, %v83_v16  ;;  %v86_v20 = vld [vmem:[#allocation5 + $0x68] sm:$0xff]  ;;  %v87_v22 = vld [vmem:[#allocation5 + $0x70] sm:$0xff]  ;;  %v88_v23 = vld [vmem:[#allocation5 + $0x78] sm:$0xff]  ;;  %s663_s14 = scalar_lea.vmem %s396_s13, 128  ;;  %p668_p11 = scmp.lt.s32.totalorder %s396_s13, %s396_s13 }
  0x3c   :  { %v552_v21 = vpack.c.bf16 %v86_v20, %v85_v19  ;;  %v556_v24 = vpack.c.bf16 %v88_v23, %v87_v22  ;;  %v66_v25 = vld [vmem:[#allocation2 + $0x8] sm:$0xff]  ;;  %v67_v26 = vld [vmem:[#allocation2 + $0x10] sm:$0xff]  ;;  %v68_v27 = vld [vmem:[#allocation2 + $0x18] sm:$0xff]  ;;  %p664_p10 = scmp.ne.s32.totalorder %s396_s13, %s663_s14  ;;  %p669_p12 = scmp.lt.s32.totalorder %s663_s14, %s663_s14 }
  0x3d   :  { %v69_v28 = vld [vmem:[#allocation2 + $0x20] sm:$0xff]  ;;  %v70_v29 = vld [vmem:[#allocation2 + $0x28] sm:$0xff]  ;;  %v71_v30 = vld [vmem:[#allocation2 + $0x30] sm:$0xff] }
  0x3e   :  { %535 = vmatpush3.bf16.msra.mxu0 %v532_v5  ;;  %v72_v31 = vld [vmem:[#allocation2 + $0x38] sm:$0xff]  ;;  %v266_v32 = vld [vmem:[#allocation7] sm:$0xff]  ;;  %v267_v33 = vld [vmem:[#allocation7 + $0x8] sm:$0xff]  ;;  %p670_p13 = por %p669_p12, %p668_p11 }
  0x3f   :  { %537 = vmatprep.subr.bf16.mxu0 %v536_v8  ;;  %v561_v34 = vpack.c.bf16 %v267_v33, %v266_v32  ;;  %v268_v36 = vld [vmem:[#allocation7 + $0x10] sm:$0xff]  ;;  %v269_v37 = vld [vmem:[#allocation7 + $0x18] sm:$0xff]  ;;  %v270_v39 = vld [vmem:[#allocation7 + $0x20] sm:$0xff] }
  0x40   :  { %v564_v38 = vpack.c.bf16 %v269_v37, %v268_v36  ;;  %v271_v40 = vld [vmem:[#allocation7 + $0x28] sm:$0xff]  ;;  %v272_v42 = vld [vmem:[#allocation7 + $0x30] sm:$0xff]  ;;  %v273_v43 = vld [vmem:[#allocation7 + $0x38] sm:$0xff]  ;;  %p671_p0 = pnand %p670_p13, %p664_p10 }
  0x41   :  { %562 = vmatpush3.bf16.msra.mxu1 %v561_v34  ;;  %v567_v41 = vpack.c.bf16 %v271_v40, %v270_v39  ;;  %v570_v44 = vpack.c.bf16 %v273_v43, %v272_v42  ;;  %v274_v45 = vld [vmem:[#allocation7 + $0x40] sm:$0xff]  ;;  %v275_v46 = vld [vmem:[#allocation7 + $0x48] sm:$0xff]  ;;  %v276_v48 = vld [vmem:[#allocation7 + $0x50] sm:$0xff] }
  0x42   :  { %539 = vmatpush3.bf16.msra.mxu0 %v536_v8  ;;  %563 = vmatprep.subr.bf16.mxu1 %v696_v35  ;;  %v573_v47 = vpack.c.bf16 %v275_v46, %v274_v45  ;;  %v277_v49 = vld [vmem:[#allocation7 + $0x58] sm:$0xff]  ;;  %v278_v51 = vld [vmem:[#allocation7 + $0x60] sm:$0xff]  ;;  %v279_v52 = vld [vmem:[#allocation7 + $0x68] sm:$0xff] }
  0x43   :  { %541 = vmatprep.subr.bf16.mxu0 %v540_v12  ;;  %v576_v50 = vpack.c.bf16 %v277_v49, %v276_v48  ;;  %v579_v53 = vpack.c.bf16 %v279_v52, %v278_v51  ;;  %v280_v54 = vld [vmem:[#allocation7 + $0x70] sm:$0xff]  ;;  %v281_v55 = vld [vmem:[#allocation7 + $0x78] sm:$0xff]  ;;  %v405_v58 = vld [vmem:[%s811_s2] ss:$0 sm:$0xff] }
  0x44   :  { %v582_v56 = vpack.c.bf16 %v281_v55, %v280_v54  ;;  %v209_v62 = vld [vmem:[%s814_s5] sm:$0xff] }
  0x45   :  { %565 = vmatpush3.bf16.msra.mxu1 %v564_v38 }
  0x46   :  { %543 = vmatpush3.bf16.msra.mxu0 %v540_v12  ;;  %566 = vmatprep.subr.bf16.mxu1 %v696_v35 }
  0x47   :  { %545 = vmatprep.subr.bf16.mxu0 %v544_v15 }
  0x49   :  { %568 = vmatpush3.bf16.msra.mxu1 %v567_v41 }
  0x4a   :  { %547 = vmatpush3.bf16.msra.mxu0 %v544_v15  ;;  %569 = vmatprep.subr.bf16.mxu1 %v696_v35 }
  0x4b   :  { %549 = vmatprep.subr.bf16.mxu0 %v548_v18 }
  0x4d   :  { %571 = vmatpush3.bf16.msra.mxu1 %v570_v44 }
  0x4e   :  { %551 = vmatpush3.bf16.msra.mxu0 %v548_v18  ;;  %572 = vmatprep.subr.bf16.mxu1 %v696_v35 }
  0x4f   :  { %553 = vmatprep.subr.bf16.mxu0 %v552_v21 }
  0x51   :  { %574 = vmatpush3.bf16.msra.mxu1 %v573_v47 }
  0x52   :  { %555 = vmatpush3.bf16.msra.mxu0 %v552_v21  ;;  %575 = vmatprep.subr.bf16.mxu1 %v696_v35 }
  0x53   :  { %557 = vmatprep.subr.bf16.mxu0 %v556_v24 }
  0x55   :  { %577 = vmatpush3.bf16.msra.mxu1 %v576_v50 }
  0x56   :  { %559 = vmatpush3.bf16.msra.mxu0 %v556_v24  ;;  %578 = vmatprep.subr.bf16.mxu1 %v696_v35 }
  0x59   :  { %482 = vmatmul.mubr.f32.vlgmr.msra.gmra.mrb[0].mxu0 %v66_v25  ;;  %580 = vmatpush3.bf16.msra.mxu1 %v579_v53 }
  0x5a   :  { %484 = vmatprep.mubr.f32.mxu0 %v67_v26  ;;  %581 = vmatprep.subr.bf16.mxu1 %v696_v35 }
  0x5d   :  { %485 = vmatmul.mubr.f32.gmra.mrb[2].mxu0 %v68_v27  ;;  %583 = vmatpush3.bf16.msra.mxu1 %v582_v56 }
  0x5e   :  { %487 = vmatprep.mubr.f32.mxu0 %v69_v28 }
  0x61   :  { %488 = vmatmul.mubr.f32.gmra.mrb[4].mxu0 %v70_v29 }
  0x62   :  { %490 = vmatprep.mubr.f32.mxu0 %v71_v30 }
  0x65   :  { %491 = vmatmul.mubr.f32.gmra.mrb[6].mxu0 %v72_v31 }
 0x12c   :  { %v483_v59 = vpop.f32.mrb[0].mxu0 }
 0x12d   :  { %v168_v60 = vadd.f32 %v483_v59, %v405_v58  ;;  %v162_v61 = vpop.f32.mrb[1].mxu0 }
 0x12e   :  { %v163_v63 = vadd.f32 %v405_v58, %v162_v61 }
 0x12f   :  { %v202_v0 = vmax.f32 %v168_v60, 0.0 }
 0x130   :  { %v201_v1 = vmax.f32 %v163_v63, 0.0  ;;  %v486_v2 = vpop.f32.mrb[2].mxu0 }
 0x131   :  { %v211_v3 = vmul.f32 %v209_v62, %v202_v0  ;;  %v178_v4 = vadd.f32 %v486_v2, %v405_v58  ;;  %v172_v5 = vpop.f32.mrb[3].mxu0 }
 0x132   :  { %v210_v6 = vmul.f32 %v209_v62, %v201_v1  ;;  %v173_v7 = vadd.f32 %v405_v58, %v172_v5 }
 0x133   :  { %v224_v8 = vrot.slane %v211_v3, 4  ;;  %v204_v9 = vmax.f32 %v178_v4, 0.0 }
 0x134   :  { %v218_v10 = vrot.slane %v210_v6, 4  ;;  %v203_v11 = vmax.f32 %v173_v7, 0.0  ;;  %v489_v12 = vpop.f32.mrb[4].mxu0 }
 0x135   :  { %v225_v13 = vmax.f32 %v211_v3, %v224_v8  ;;  %v213_v14 = vmul.f32 %v209_v62, %v204_v9  ;;  %v188_v15 = vadd.f32 %v489_v12, %v405_v58  ;;  %v182_v16 = vpop.f32.mrb[5].mxu0 }
 0x136   :  { %v219_v17 = vmax.f32 %v210_v6, %v218_v10  ;;  %v212_v18 = vmul.f32 %v209_v62, %v203_v11  ;;  %v183_v19 = vadd.f32 %v405_v58, %v182_v16 }
 0x137   :  { %v226_v20 = vrot.slane %v225_v13, 2  ;;  %v236_v21 = vrot.slane %v213_v14, 4  ;;  %v206_v22 = vmax.f32 %v188_v15, 0.0 }
 0x138   :  { %v220_v23 = vrot.slane %v219_v17, 2  ;;  %v230_v24 = vrot.slane %v212_v18, 4  ;;  %v205_v25 = vmax.f32 %v183_v19, 0.0  ;;  %v492_v26 = vpop.f32.mrb[6].mxu0  ;;  %v406_v19 = vld [vmem:[%s813_s4] ss:$0 sm:$0xff] }
 0x139   :  { %v227_v27 = vmax.f32 %v225_v13, %v226_v20  ;;  %v237_v28 = vmax.f32 %v213_v14, %v236_v21  ;;  %v215_v29 = vmul.f32 %v209_v62, %v206_v22  ;;  %v198_v30 = vadd.f32 %v492_v26, %v405_v58  ;;  %v192_v31 = vpop.f32.mrb[7].mxu0 }
 0x13a   :  { %v221_v32 = vmax.f32 %v219_v17, %v220_v23  ;;  %v231_v33 = vmax.f32 %v212_v18, %v230_v24  ;;  %v214_v34 = vmul.f32 %v209_v62, %v205_v25  ;;  %v193_v35 = vadd.f32 %v405_v58, %v192_v31 }
 0x13b   :  { %v228_v36 = vrot.slane %v227_v27, 1  ;;  %v238_v37 = vrot.slane %v237_v28, 2  ;;  %v248_v38 = vrot.slane %v215_v29, 4  ;;  %v208_v39 = vmax.f32 %v198_v30, 0.0 }
 0x13c   :  { %v222_v40 = vrot.slane %v221_v32, 1  ;;  %v232_v41 = vrot.slane %v231_v33, 2  ;;  %v242_v42 = vrot.slane %v214_v34, 4  ;;  %v207_v43 = vmax.f32 %v193_v35, 0.0 }
 0x13d   :  { %v229_v44 = vmax.f32 %v227_v27, %v228_v36  ;;  %v239_v45 = vmax.f32 %v237_v28, %v238_v37  ;;  %v249_v46 = vmax.f32 %v215_v29, %v248_v38  ;;  %v217_v47 = vmul.f32 %v209_v62, %v208_v39 }
 0x13e   :  { %v223_v48 = vmax.f32 %v221_v32, %v222_v40  ;;  %v233_v49 = vmax.f32 %v231_v33, %v232_v41  ;;  %v243_v50 = vmax.f32 %v214_v34, %v242_v42  ;;  %v216_v51 = vmul.f32 %v209_v62, %v207_v43 }
 0x13f   :  { %v240_v52 = vrot.slane %v239_v45, 1  ;;  %v250_v53 = vrot.slane %v249_v46, 2  ;;  %v260_v54 = vrot.slane %v217_v47, 4 }
 0x140   :  { %v298_v55 = vsel %vm297_vm1, %v229_v44, %v223_v48  ;;  %v234_v56 = vrot.slane %v233_v49, 1  ;;  %v244_v57 = vrot.slane %v243_v50, 2  ;;  %v254_v58 = vrot.slane %v216_v51, 4 }
 0x141   :  { %v251_v59 = vmax.f32 %v249_v46, %v250_v53  ;;  %v261_v60 = vmax.f32 %v217_v47, %v260_v54  ;;  %v241_v1 = vmax.f32 %v239_v45, %v240_v52 }
 0x142   :  { %v235_v61 = vmax.f32 %v233_v49, %v234_v56  ;;  %v245_v63 = vmax.f32 %v243_v50, %v244_v57  ;;  %v255_v0 = vmax.f32 %v216_v51, %v254_v58 }
 0x143   :  { %v252_v2 = vrot.slane %v251_v59, 1  ;;  %v262_v3 = vrot.slane %v261_v60, 2 }
 0x144   :  { %v246_v4 = vrot.slane %v245_v63, 1  ;;  %v256_v62 = vrot.slane %v255_v0, 2  ;;  %v300_v5 = vsel %vm299_vm2, %v235_v61, %v298_v55 }
 0x145   :  { %v263_v6 = vmax.f32 %v261_v60, %v262_v3  ;;  %v302_v7 = vsel %vm301_vm3, %v241_v1, %v300_v5  ;;  %v253_v10 = vmax.f32 %v251_v59, %v252_v2 }
 0x146   :  { %v247_v8 = vmax.f32 %v245_v63, %v246_v4  ;;  %v257_v9 = vmax.f32 %v255_v0, %v256_v62 }
 0x147   :  { %v264_v11 = vrot.slane %v263_v6, 1 }
 0x148   :  { %v258_v12 = vrot.slane %v257_v9, 1  ;;  %v304_v13 = vsel %vm303_vm4, %v247_v8, %v302_v7 }
 0x149   :  { %v306_v14 = vsel %vm305_vm5, %v253_v10, %v304_v13  ;;  %v265_v16 = vmax.f32 %v263_v6, %v264_v11 }
 0x14a   :  { %v259_v15 = vmax.f32 %v257_v9, %v258_v12 }
 0x14c   :  { %v308_v17 = vsel %vm307_vm6, %v259_v15, %v306_v14 }
 0x14d   :  { %v310_v18 = vsel %vm309_vm7, %v265_v16, %v308_v17 }
 0x14e   :  { %526 = vmatmul.mubr.f32.vlgmr.msra.gmra.mrb[0].mxu1 %v310_v18 }
 0x221   :  { %v378_v20 = vpop.f32.mrb[0].mxu1 }
 0x222   :  { %v379_v21 = vadd.f32 %v406_v19, %v378_v20  ;;  %v527_v22 = vpop.f32.mrb[1].mxu1 }
 0x224   :  { %v407_v23 = vmul.f32 -1.442695, %v379_v21 }
 0x226   :  { %593 = vpow2.f32 %v407_v23 }
 0x230   :  { %v594_v24 = vpop.eup %593 }
 0x231   :  { %v385_v25 = vadd.f32 1.0, %v594_v24 }
 0x233   :  { %595 = vrcp.f32 %v385_v25 }
 0x23d   :  { %v596_v26 = vpop.eup %595 }
 0x23e   :  { %388 = vst [vmem:[#allocation8] sm:$0xff] %v596_v26 }
 0x23f   :  { %674 = shalt.err (!%p671_p0)
}
 0x240   :  { %s675_s16 = scalar_lea.hbm %s815_s6, 128 }
 0x241   :  { %p676_p1 = scmp.ne.s32.totalorder %s815_s6, %s675_s16  ;;  %p679_p2 = scmp.lt.u32.totalorder %s675_s16, %s815_s6 }
 0x243   :  { %p681_p3 = pnand %p679_p2, %p676_p1 }
 0x245   :  { %684 = shalt.err (!%p681_p3)
}
 0x246   :  { %398 = dma.vmem_to_hbm [thread:$0]  %s396_s13, 128, %s815_s6, [#allocation4]  }
 0x247   :  { %689 = dma.done.wait [#allocation4], 128  }
 0x248   :  { %690 = vsyncadd [#allocation4], 4294967168 }
 0x249   :  { %402 = vsyncpa [#allocation3], 1 }
 0x24a   :  { %403 = vsyncpa [#allocation6], 1 }
 0x24b   :  { %404 = vsyncpa [#allocation4], 1 }

</bundles_post_ra>
